<compile_context>
chip_gen: v7x
topology: tpu7x:2x2x1
jax: 0.10.0
libtpu: 0.0.40
codegen_flags: <defaults>
</compile_context>

<pallas_src>
import functools

import jax
import jax.numpy as jnp
from jax.experimental import pallas as pl
from jax.experimental.pallas import tpu as pltpu


def _round_up(x, m):
    return ((x + m - 1) // m) * m


def _cdiv(a, b):
    return (a + b - 1) // b


def _focal_loss_kernel(logits_ref, targets_ref, alpha_ref, out_ref, acc_ref, *,
                       gamma, tile_l, blocks_per_chunk, total_lanes, n_valid):
    i = pl.program_id(1)                    # block index inside the chunk

    # Zero the VMEM-resident accumulator at the start of each chunk.
    @pl.when(i == 0)
    def _init():
        acc_ref[...] = jnp.zeros_like(acc_ref)

    logits = logits_ref[...].astype(jnp.float32)       # (C, 8, T) f32
    tgt = targets_ref[...]                              # (8, T)   int32

    # Single pass over the logits tile: max / logsumexp / one-hot gathers as
    # whole-tile ops over the class (leading, untiled) axis -> pure VPU adds.
    m = jnp.max(logits, axis=0)                                   # (8, T)
    sum_e = jnp.sum(jnp.exp(logits - m[None, :, :]), axis=0)      # (8, T)

    cls = jax.lax.broadcasted_iota(jnp.int32, logits.shape, 0)
    hit = cls == tgt[None, :, :]                                  # (C, 8, T)
    logit_t = jnp.sum(jnp.where(hit, logits, 0.0), axis=0)        # (8, T)
    alpha_b = jnp.broadcast_to(alpha_ref[...], logits.shape)
    alpha_t = jnp.sum(jnp.where(hit, alpha_b, 0.0), axis=0)       # (8, T)

    # log p_t straight from log-sum-exp (no softmax divide, no log(underflow)).
    log_p = logit_t - (m + jnp.log(sum_e))
    prob = jnp.exp(log_p)
    one_minus_p = jnp.maximum(1.0 - prob, 0.0)

    # gamma is a compile-time Python float: special-case cheap exponents.
    if gamma == 0.0:
        focal = jnp.ones_like(one_minus_p)
    elif gamma == 0.5:
        focal = jnp.sqrt(one_minus_p)
    elif gamma == 1.0:
        focal = one_minus_p
    elif gamma == 2.0:
        focal = one_minus_p * one_minus_p
    else:
        # (1-p)^gamma at p==1 evaluates to ~1e-30**gamma instead of exactly 0,
        # but it is multiplied by log_p ~= 0, so the error is negligible.
        focal = jnp.exp(gamma * jnp.log(jnp.maximum(one_minus_p, 1e-30)))

    per_elem = -alpha_t * focal * log_p                           # (8, T)

    # Tail handling.  Element (s, l_global) maps to original batch index
    # n = s * total_lanes + l_global; it is valid iff l_global < total_lanes
    # (Pallas ragged-block padding) and n < n_valid (<=7-element batch pad and
    # clamped out-of-range chunk blocks).  Interior blocks skip the mask.
    b = pl.program_id(0) * blocks_per_chunk + i        # logical block index
    col0 = b * tile_l
    is_full = (7 * total_lanes + col0 + tile_l) <= n_valid

    @pl.when(is_full)
    def _acc_interior():
        acc_ref[...] += per_elem

    @pl.when(jnp.logical_not(is_full))
    def _acc_tail():
        lane = col0 + jax.lax.broadcasted_iota(jnp.int32, per_elem.shape, 1)
        sub = jax.lax.broadcasted_iota(jnp.int32, per_elem.shape, 0)
        ok = (lane < total_lanes) & (sub * total_lanes + lane < n_valid)
        acc_ref[...] += jnp.where(ok, per_elem, 0.0)

    # Fold the chunk reduction in-kernel: one cross-lane (XLU) reduce at the
    # last step of the chunk; only (8, 1) floats per chunk reach HBM.
    @pl.when(i == blocks_per_chunk - 1)
    def _finalize():
        out_ref[...] = jnp.sum(acc_ref[...], axis=1,
                               keepdims=True).reshape(1, 8, 1)


def _choose_num_parallel(total_blocks, requested):
    if requested is not None:
        return max(1, min(int(requested), total_blocks))
    for cand in (8, 4, 2):
        if total_blocks >= cand and total_blocks % cand == 0:
            return cand                      # even split -> no clamped blocks
    if total_blocks >= 16:
        return 8                             # imbalance bounded by 1 block
    return 1


def focal_loss(logits, targets, alpha, *, gamma=0.5, size_average=True,
               num_parallel=None, max_tile_elems=131072,
               per_tile_budget_bytes=2 * 1024 * 1024,
               logits_in_cn_layout=False):
    """Pallas FocalLoss forward.

    logits:  (N, C) float (any float dtype; kept native in HBM), or (C, N) if
             logits_in_cn_layout=True (avoids the wrapper-side relayout copy).
    targets: (N,)   integer class ids in [0, C)
    alpha:   (C, 1) or (C,) float per-class weights (module default: ones)
    """
    if logits_in_cn_layout:
        c, n = logits.shape
        logits_cn = logits
    else:
        n, c = logits.shape
        # TODO(synk): fuse this transpose into the producing matmul's output
        # layout (or call with logits_in_cn_layout=True) to drop one HBM pass.
        logits_cn = logits.T
    if c > 64:
        # TODO(synk): vocab-scale C needs an inner "arbitrary" grid axis over
        # classes with an online logsumexp; not implemented here.
        raise NotImplementedError("focal_loss Pallas kernel supports class_num <= 64")

    # Pack the batch onto sublanes as well as lanes: (C, N) -> (C, 8, L).
    # Only a tiny (<8 column) pad is needed when N % 8 != 0.
    n_pad = _round_up(max(n, 8), 8)
    targets_flat = targets.astype(jnp.int32)
    if n_pad != n:
        logits_cn = jnp.pad(logits_cn, ((0, 0), (0, n_pad - n)))
        targets_flat = jnp.pad(targets_flat, (0, n_pad - n))
    total_lanes = n_pad // 8
    logits_pkd = logits_cn.reshape(c, 8, total_lanes)     # free contiguous reshape
    targets_pkd = targets_flat.reshape(8, total_lanes)
    alpha_col = jnp.asarray(alpha, jnp.float32).reshape(c, 1, 1)

    # Tile size: ~per_tile_budget of f32-equivalent logits per grid step (f32
    # working set dominates even for bf16 inputs), capped at max_tile_elems.
    elems_cap = max(1024, (per_tile_budget_bytes // (4 * c)) // 1024 * 1024)
    tile_elems = int(min(int(max_tile_elems), elems_cap))
    tile_l = tile_elems // 8                               # multiple of 128
    if total_lanes <= tile_l:
        tile_l = total_lanes                               # full-dim block
    total_blocks = _cdiv(total_lanes, tile_l)

    num_par = _choose_num_parallel(total_blocks, num_parallel)
    bpc = _cdiv(total_blocks, num_par)
    last_block = total_blocks - 1

    def _blk(p, i):
        # Clamp out-of-range blocks from the num_par round-up; their
        # contribution is masked to zero inside the kernel.
        return jnp.minimum(p * bpc + i, last_block)

    kernel = functools.partial(
        _focal_loss_kernel,
        gamma=float(gamma), tile_l=int(tile_l), blocks_per_chunk=int(bpc),
        total_lanes=int(total_lanes), n_valid=int(n))

    partials = pl.pallas_call(
        kernel,
        out_shape=jax.ShapeDtypeStruct((num_par, 8, 1), jnp.float32),
        grid_spec=pltpu.PrefetchScalarGridSpec(
            num_scalar_prefetch=0,
            grid=(num_par, bpc),
            in_specs=[
                pl.BlockSpec((c, 8, tile_l), lambda p, i: (0, 0, _blk(p, i))),
                pl.BlockSpec((8, tile_l), lambda p, i: (0, _blk(p, i))),
                pl.BlockSpec((c, 1, 1), lambda p, i: (0, 0, 0)),
            ],
            out_specs=pl.BlockSpec((1, 8, 1), lambda p, i: (p, 0, 0)),
            scratch_shapes=[pltpu.VMEM((8, tile_l), jnp.float32)],
        ),
        compiler_params=pltpu.CompilerParams(
            dimension_semantics=("parallel", "arbitrary"),
            vmem_limit_bytes=48 * 1024 * 1024,
        ),
    )(logits_pkd, targets_pkd, alpha_col)

    total = jnp.sum(partials)               # num_par*8 floats
    if size_average:
        total = total / jnp.float32(n)
    return total


def _focal_loss_ref(logits, targets, alpha, gamma, size_average):
    """Pure-JAX reference (same math as the PyTorch module)."""
    logp_all = jax.nn.log_softmax(logits.astype(jnp.float32), axis=1)
    logp_t = jnp.take_along_axis(logp_all, targets[:, None], axis=1)
    p_t = jnp.exp(logp_t)
    a_t = jnp.asarray(alpha, jnp.float32).reshape(-1)[targets][:, None]
    loss = -a_t * jnp.power(jnp.maximum(1.0 - p_t, 0.0), gamma) * logp_t
    return jnp.mean(loss) if size_average else jnp.sum(loss)


if __name__ == "__main__":
    class_num = 4
    key = jax.random.PRNGKey(0)
    k1, k2, k3, k4, k5, k6, k7, k8 = jax.random.split(key, 8)
    alpha_ones = jnp.ones((class_num, 1), dtype=jnp.float32)
    alpha_var = (jnp.arange(1, class_num + 1, dtype=jnp.float32)
                 .reshape(class_num, 1) / class_num)

    # --- test 1: module defaults (alpha = ones, gamma = 0.5, mean) ----------
    n1 = 8
    logits1 = jax.random.normal(k1, (n1, class_num), dtype=jnp.float32)
    targets1 = jax.random.randint(k2, (n1,), 0, class_num, dtype=jnp.int32)
    out1 = jax.block_until_ready(
        focal_loss(logits1, targets1, alpha_ones, gamma=0.5, size_average=True))
    ref1 = _focal_loss_ref(logits1, targets1, alpha_ones, 0.5, True)
    assert jnp.allclose(out1, ref1, rtol=1e-5, atol=1e-6), (out1, ref1)

    # --- test 2: ragged batch (tail mask), non-uniform alpha, gamma=2, sum --
    n2 = 300
    logits2 = jax.random.normal(k3, (n2, class_num), dtype=jnp.float32) * 3.0
    targets2 = jax.random.randint(k4, (n2,), 0, class_num, dtype=jnp.int32)
    out2 = jax.block_until_ready(
        focal_loss(logits2, targets2, alpha_var, gamma=2.0, size_average=False))
    ref2 = _focal_loss_ref(logits2, targets2, alpha_var, 2.0, False)
    assert jnp.allclose(out2, ref2, rtol=1e-4, atol=1e-4), (out2, ref2)

    # --- test 3: bf16 logits stay bf16 in HBM; f32 cast happens in-kernel ---
    logits3 = logits2.astype(jnp.bfloat16)
    out3 = jax.block_until_ready(
        focal_loss(logits3, targets2, alpha_ones, gamma=0.5, size_average=True))
    ref3 = _focal_loss_ref(logits3.astype(jnp.float32), targets2, alpha_ones,
                           0.5, True)
    assert jnp.allclose(out3, ref3, rtol=1e-5, atol=1e-5), (out3, ref3)

    # --- test 4: multi-block grid, uneven chunks (clamped block), gamma=1.5 -
    n4 = 4500
    logits4 = jax.random.normal(k5, (n4, class_num), dtype=jnp.float32) * 2.0
    targets4 = jax.random.randint(k6, (n4,), 0, class_num, dtype=jnp.int32)
    out4 = jax.block_until_ready(
        focal_loss(logits4, targets4, alpha_var, gamma=1.5, size_average=False,
                   max_tile_elems=1024, num_parallel=2))
    ref4 = _focal_loss_ref(logits4, targets4, alpha_var, 1.5, False)
    assert jnp.allclose(out4, ref4, rtol=2e-4, atol=1e-3), (out4, ref4)

    # --- test 5: evenly divisible auto-chosen parallel chunks (8 x 1 blocks) -
    n5 = 8192
    logits5 = jax.random.normal(k7, (n5, class_num), dtype=jnp.float32)
    targets5 = jax.random.randint(k8, (n5,), 0, class_num, dtype=jnp.int32)
    out5 = jax.block_until_ready(
        focal_loss(logits5, targets5, alpha_ones, gamma=2.0, size_average=True,
                   max_tile_elems=1024))
    ref5 = _focal_loss_ref(logits5, targets5, alpha_ones, 2.0, True)
    assert jnp.allclose(out5, ref5, rtol=1e-4, atol=1e-5), (out5, ref5)

    print("KERNEL_OK")
</pallas_src>

<mosaic_0001>
module attributes {stable_mosaic.version = 11 : i64} {
  func.func @_focal_loss_kernel(%arg0: i32, %arg1: i32, %arg2: memref<4x8x1xf32, #tpu.memory_space<vmem>>, %arg3: memref<8x1xi32, #tpu.memory_space<vmem>>, %arg4: memref<4x1x1xf32, #tpu.memory_space<vmem>>, %arg5: memref<1x8x1xf32, #tpu.memory_space<vmem>>, %arg6: memref<8x1xf32, #tpu.memory_space<vmem>>) attributes {dimension_semantics = [#tpu.dimension_semantics<parallel>, #tpu.dimension_semantics<arbitrary>], iteration_bounds = array<i64: 1, 1>, scalar_prefetch = 0 : i64, scratch_operands = 1 : i64, tpu.core_type = #tpu.core_type<tc>, window_params = [{transform_indices = @transform_0, window_bounds = array<i64: 4, 8, 1>}, {transform_indices = @transform_1, window_bounds = array<i64: 8, 1>}, {pipeline_mode = #tpu.pipeline_mode<synchronous>, transform_indices = @transform_2, window_bounds = array<i64: 4, 1, 1>}, {transform_indices = @transform_3, window_bounds = array<i64: 1, 8, 1>}]} {
    %c0_i32 = arith.constant 0 : i32
    %0 = arith.cmpi eq, %arg1, %c0_i32 : i32
    %1 = arith.extui %0 : i1 to i32
    %c0_i32_0 = arith.constant 0 : i32
    %2 = arith.cmpi ne, %1, %c0_i32_0 : i32
    scf.if %2 {
      %cst_22 = arith.constant 0.000000e+00 : f32
      %51 = vector.broadcast %cst_22 : f32 to vector<8x1xf32>
      %c0_23 = arith.constant 0 : index
      %c0_24 = arith.constant 0 : index
      %52 = vector.load %arg6[%c0_23, %c0_24] : memref<8x1xf32, #tpu.memory_space<vmem>>, vector<8x1xf32>
      tpu.vector_store %arg6[%c0_23, %c0_24], %51 {strides = array<i32>} : memref<8x1xf32, #tpu.memory_space<vmem>>, vector<8x1xf32>,
    } else {
    }
    %c0 = arith.constant 0 : index
    %c0_1 = arith.constant 0 : index
    %c0_2 = arith.constant 0 : index
    %3 = vector.load %arg2[%c0, %c0_1, %c0_2] : memref<4x8x1xf32, #tpu.memory_space<vmem>>, vector<4x8x1xf32>
    %c0_3 = arith.constant 0 : index
    %c0_4 = arith.constant 0 : index
    %4 = vector.load %arg3[%c0_3, %c0_4] : memref<8x1xi32, #tpu.memory_space<vmem>>, vector<8x1xi32>
    %cst = arith.constant dense<0xFF800000> : vector<8x1xf32>
    %5 = vector.multi_reduction <maximumf>, %3, %cst [0] : vector<4x8x1xf32> to vector<8x1xf32>
    %6 = vector.shape_cast %5 : vector<8x1xf32> to vector<1x8x1xf32>
    %7 = vector.broadcast %6 : vector<1x8x1xf32> to vector<4x8x1xf32>
    %8 = arith.subf %3, %7 : vector<4x8x1xf32>
    %9 = math.exp %8 : vector<4x8x1xf32>
    %cst_5 = arith.constant dense<0.000000e+00> : vector<8x1xf32>
    %10 = vector.multi_reduction <add>, %9, %cst_5 [0] : vector<4x8x1xf32> to vector<8x1xf32>
    %11 = tpu.iota {dimensions = array<i32: 0>} : vector<4x8x1xi32>
    %12 = vector.shape_cast %4 : vector<8x1xi32> to vector<1x8x1xi32>
    %13 = vector.broadcast %12 : vector<1x8x1xi32> to vector<4x8x1xi32>
    %14 = arith.cmpi eq, %11, %13 : vector<4x8x1xi32>
    %cst_6 = arith.constant 0.000000e+00 : f32
    %15 = vector.broadcast %cst_6 : f32 to vector<4x8x1xf32>
    %16 = arith.select %14, %3, %15 : vector<4x8x1xi1>, vector<4x8x1xf32>
    %cst_7 = arith.constant dense<0.000000e+00> : vector<8x1xf32>
    %17 = vector.multi_reduction <add>, %16, %cst_7 [0] : vector<4x8x1xf32> to vector<8x1xf32>
    %c0_8 = arith.constant 0 : index
    %c0_9 = arith.constant 0 : index
    %c0_10 = arith.constant 0 : index
    %18 = vector.load %arg4[%c0_8, %c0_9, %c0_10] : memref<4x1x1xf32, #tpu.memory_space<vmem>>, vector<4x1x1xf32>
    %19 = vector.shape_cast %18 : vector<4x1x1xf32> to vector<4x1x1xf32>
    %20 = vector.broadcast %19 : vector<4x1x1xf32> to vector<4x8x1xf32>
    %cst_11 = arith.constant 0.000000e+00 : f32
    %21 = vector.broadcast %cst_11 : f32 to vector<4x8x1xf32>
    %22 = arith.select %14, %20, %21 : vector<4x8x1xi1>, vector<4x8x1xf32>
    %cst_12 = arith.constant dense<0.000000e+00> : vector<8x1xf32>
    %23 = vector.multi_reduction <add>, %22, %cst_12 [0] : vector<4x8x1xf32> to vector<8x1xf32>
    %24 = math.log %10 : vector<8x1xf32>
    %25 = arith.addf %5, %24 : vector<8x1xf32>
    %26 = arith.subf %17, %25 : vector<8x1xf32>
    %27 = math.exp %26 : vector<8x1xf32>
    %cst_13 = arith.constant 1.000000e+00 : f32
    %28 = vector.broadcast %cst_13 : f32 to vector<8x1xf32>
    %29 = arith.subf %28, %27 : vector<8x1xf32>
    %cst_14 = arith.constant 0.000000e+00 : f32
    %30 = vector.broadcast %cst_14 : f32 to vector<8x1xf32>
    %31 = arith.maximumf %29, %30 : vector<8x1xf32>
    %32 = math.sqrt %31 : vector<8x1xf32>
    %cst_15 = arith.constant 0.000000e+00 : f32
    %33 = vector.broadcast %cst_15 : f32 to vector<8x1xf32>
    %34 = arith.subf %33, %23 : vector<8x1xf32>
    %35 = arith.mulf %34, %32 : vector<8x1xf32>
    %36 = arith.mulf %35, %26 : vector<8x1xf32>
    %c1_i32 = arith.constant 1 : i32
    %37 = arith.muli %arg0, %c1_i32 : i32
    %38 = arith.addi %37, %arg1 : i32
    %c1_i32_16 = arith.constant 1 : i32
    %39 = arith.muli %38, %c1_i32_16 : i32
    %c7_i32 = arith.constant 7 : i32
    %40 = arith.addi %c7_i32, %39 : i32
    %c1_i32_17 = arith.constant 1 : i32
    %41 = arith.addi %40, %c1_i32_17 : i32
    %c8_i32 = arith.constant 8 : i32
    %42 = arith.cmpi sle, %41, %c8_i32 : i32
    %43 = arith.extui %42 : i1 to i32
    %c0_i32_18 = arith.constant 0 : i32
    %44 = arith.cmpi ne, %43, %c0_i32_18 : i32
    scf.if %44 {
      %c0_22 = arith.constant 0 : index
      %c0_23 = arith.constant 0 : index
      %51 = vector.load %arg6[%c0_22, %c0_23] : memref<8x1xf32, #tpu.memory_space<vmem>>, vector<8x1xf32>
      %52 = arith.addf %51, %36 : vector<8x1xf32>
      %c0_24 = arith.constant 0 : index
      %c0_25 = arith.constant 0 : index
      %53 = vector.load %arg6[%c0_24, %c0_25] : memref<8x1xf32, #tpu.memory_space<vmem>>, vector<8x1xf32>
      tpu.vector_store %arg6[%c0_24, %c0_25], %52 {strides = array<i32>} : memref<8x1xf32, #tpu.memory_space<vmem>>, vector<8x1xf32>,
    } else {
    }
    %true = arith.constant true
    %45 = arith.xori %42, %true : i1
    %46 = arith.extui %45 : i1 to i32
    %c0_i32_19 = arith.constant 0 : i32
    %47 = arith.cmpi ne, %46, %c0_i32_19 : i32
    scf.if %47 {
      %51 = tpu.iota {dimensions = array<i32: 1>} : vector<8x1xi32>
      %52 = vector.broadcast %39 : i32 to vector<8x1xi32>
      %53 = arith.addi %52, %51 : vector<8x1xi32>
      %54 = tpu.iota {dimensions = array<i32: 0>} : vector<8x1xi32>
      %c1_i32_22 = arith.constant 1 : i32
      %55 = vector.broadcast %c1_i32_22 : i32 to vector<8x1xi32>
      %56 = arith.cmpi slt, %53, %55 : vector<8x1xi32>
      %c1_i32_23 = arith.constant 1 : i32
      %57 = vector.broadcast %c1_i32_23 : i32 to vector<8x1xi32>
      %58 = arith.muli %54, %57 : vector<8x1xi32>
      %59 = arith.addi %58, %53 : vector<8x1xi32>
      %c8_i32_24 = arith.constant 8 : i32
      %60 = vector.broadcast %c8_i32_24 : i32 to vector<8x1xi32>
      %61 = arith.cmpi slt, %59, %60 : vector<8x1xi32>
      %62 = arith.andi %56, %61 : vector<8x1xi1>
      %c0_25 = arith.constant 0 : index
      %c0_26 = arith.constant 0 : index
      %63 = vector.load %arg6[%c0_25, %c0_26] : memref<8x1xf32, #tpu.memory_space<vmem>>, vector<8x1xf32>
      %cst_27 = arith.constant 0.000000e+00 : f32
      %64 = vector.broadcast %cst_27 : f32 to vector<8x1xf32>
      %65 = arith.select %62, %36, %64 : vector<8x1xi1>, vector<8x1xf32>
      %66 = arith.addf %63, %65 : vector<8x1xf32>
      %c0_28 = arith.constant 0 : index
      %c0_29 = arith.constant 0 : index
      %67 = vector.load %arg6[%c0_28, %c0_29] : memref<8x1xf32, #tpu.memory_space<vmem>>, vector<8x1xf32>
      tpu.vector_store %arg6[%c0_28, %c0_29], %66 {strides = array<i32>} : memref<8x1xf32, #tpu.memory_space<vmem>>, vector<8x1xf32>,
    } else {
    }
    %c0_i32_20 = arith.constant 0 : i32
    %48 = arith.cmpi eq, %arg1, %c0_i32_20 : i32
    %49 = arith.extui %48 : i1 to i32
    %c0_i32_21 = arith.constant 0 : i32
    %50 = arith.cmpi ne, %49, %c0_i32_21 : i32
    scf.if %50 {
      %c0_22 = arith.constant 0 : index
      %c0_23 = arith.constant 0 : index
      %51 = vector.load %arg6[%c0_22, %c0_23] : memref<8x1xf32, #tpu.memory_space<vmem>>, vector<8x1xf32>
      %cst_24 = arith.constant dense<0.000000e+00> : vector<8xf32>
      %52 = vector.multi_reduction <add>, %51, %cst_24 [1] : vector<8x1xf32> to vector<8xf32>
      %53 = vector.shape_cast %52 : vector<8xf32> to vector<8x1xf32>
      %54 = vector.shape_cast %53 : vector<8x1xf32> to vector<1x8x1xf32>
      %c0_25 = arith.constant 0 : index
      %c0_26 = arith.constant 0 : index
      %c0_27 = arith.constant 0 : index
      %55 = vector.load %arg5[%c0_25, %c0_26, %c0_27] : memref<1x8x1xf32, #tpu.memory_space<vmem>>, vector<1x8x1xf32>
      tpu.vector_store %arg5[%c0_25, %c0_26, %c0_27], %54 {strides = array<i32>} : memref<1x8x1xf32, #tpu.memory_space<vmem>>, vector<1x8x1xf32>,
    } else {
    }
    return
  }
  func.func @transform_0(%arg0: i32, %arg1: i32) -> (i32, i32, i32) {
    %c1_i32 = arith.constant 1 : i32
    %0 = arith.muli %arg0, %c1_i32 : i32
    %1 = arith.addi %0, %arg1 : i32
    %c0_i32 = arith.constant 0 : i32
    %2 = arith.minsi %1, %c0_i32 : i32
    %c0_i32_0 = arith.constant 0 : i32
    %c0_i32_1 = arith.constant 0 : i32
    %c0_i32_2 = arith.constant 0 : i32
    return %c0_i32_0, %c0_i32_1, %2 : i32, i32, i32
  }
  func.func @transform_1(%arg0: i32, %arg1: i32) -> (i32, i32) {
    %c1_i32 = arith.constant 1 : i32
    %0 = arith.muli %arg0, %c1_i32 : i32
    %1 = arith.addi %0, %arg1 : i32
    %c0_i32 = arith.constant 0 : i32
    %2 = arith.minsi %1, %c0_i32 : i32
    %c0_i32_0 = arith.constant 0 : i32
    %c0_i32_1 = arith.constant 0 : i32
    return %c0_i32_0, %2 : i32, i32
  }
  func.func @transform_2(%arg0: i32, %arg1: i32) -> (i32, i32, i32) {
    %c0_i32 = arith.constant 0 : i32
    %c0_i32_0 = arith.constant 0 : i32
    %c0_i32_1 = arith.constant 0 : i32
    %c0_i32_2 = arith.constant 0 : i32
    return %c0_i32, %c0_i32_0, %c0_i32_1 : i32, i32, i32
  }
  func.func @transform_3(%arg0: i32, %arg1: i32) -> (i32, i32, i32) {
    %c0_i32 = arith.constant 0 : i32
    %c0_i32_0 = arith.constant 0 : i32
    %c0_i32_1 = arith.constant 0 : i32
    return %arg0, %c0_i32, %c0_i32_0 : i32, i32, i32
  }
}

</mosaic_0001>

<bundles_post_ra>
// kernel: tpu_custom_call.1
= control target key start
LH: loop header
LB: loop body
LE: loop exit
PB: predicated region body
PF: predicated region fallthrough
CT: control target
= control target key end

     0   :  { %vm72_vm0 = vcmask 7168   ;;  %v246_v0 = vmov 0.0   ;;  %s324_s0 = inlined_call_operand.vmem [shape: f32[4,8,1], index: 0, kind: input, shape index: {}]   ;;  %s325_s1 = inlined_call_operand.vmem [shape: s32[8,1], index: 1, kind: input, shape index: {}]   ;;  %s326_s2 = inlined_call_operand.vmem [shape: f32[4,1,1], index: 2, kind: input, shape index: {}]   ;;  %s327_s3 = inlined_call_operand.vmem [shape: f32[1,8,1], index: 3, kind: output, shape index: {}]  }
   0x1   :  { %73 = vst.msk [vmem:[#allocation2] sm:$0xff] %vm72_vm0, %v246_v0  ;;  %v74_v1 = vld [vmem:[%s324_s0] sm:$0xff]  ;;  %v75_v2 = vld [vmem:[%s324_s0 + $0x8] sm:$0xff]  ;;  %v76_v3 = vld [vmem:[%s324_s0 + $0x10] sm:$0xff] }
   0x2   :  { %v77_v4 = vld [vmem:[%s324_s0 + $0x18] sm:$0xff]  ;;  %v80_v5 = vsel %vm72_vm0, %v74_v1, -inf  ;;  %v81_v6 = vsel %vm72_vm0, %v75_v2, -inf  ;;  %v82_v7 = vsel %vm72_vm0, %v76_v3, -inf  ;;  %v78_v21 = vld [vmem:[%s325_s1] sm:$0xff] }
   0x3   :  { %v83_v8 = vsel %vm72_vm0, %v77_v4, -inf  ;;  %v84_v9 = vmax.f32 %v80_v5, %v81_v6  ;;  %vm106_vm1 = vcmp.eq.s32.totalorder %v78_v21, 0  ;;  %vm107_vm2 = vcmp.eq.s32.totalorder %v78_v21, 1  ;;  %v227_v48 = vld [vmem:[%s326_s2] ss:$0 sm:$0xff] }
   0x4   :  { %v85_v10 = vmax.f32 %v82_v7, %v83_v8  ;;  %v110_v31 = vsel %vm106_vm1, %v74_v1, 0.0  ;;  %v111_v32 = vsel %vm107_vm2, %v75_v2, 0.0  ;;  %vm108_vm3 = vcmp.eq.s32.totalorder %v78_v21, 2  ;;  %v228_v49 = vld [vmem:[%s326_s2 + $0x1] ss:$0 sm:$0xff] }
   0x5   :  { %v114_v34 = vsel %vm72_vm0, %v110_v31, 0.0  ;;  %v115_v35 = vsel %vm72_vm0, %v111_v32, 0.0  ;;  %v112_v36 = vsel %vm108_vm3, %v76_v3, 0.0  ;;  %vm109_vm4 = vcmp.eq.s32.totalorder %v78_v21, 3  ;;  %v229_v52 = vld [vmem:[%s326_s2 + $0x2] ss:$0 sm:$0xff] }
   0x6   :  { %v86_v11 = vmax.f32 %v84_v9, %v85_v10  ;;  %v116_v37 = vadd.f32 %v115_v35, %v114_v34  ;;  %v117_v38 = vsel %vm72_vm0, %v112_v36, 0.0  ;;  %v113_v39 = vsel %vm109_vm4, %v77_v4, 0.0  ;;  %v230_v58 = vld [vmem:[%s326_s2 + $0x3] ss:$0 sm:$0xff] }
   0x7   :  { %v119_v41 = vsel %vm72_vm0, %v113_v39, 0.0  ;;  %v149_v50 = vsel %vm106_vm1, %v227_v48, 0.0  ;;  %v150_v51 = vsel %vm107_vm2, %v228_v49, 0.0  ;;  %v151_v57 = vsel %vm108_vm3, %v229_v52, 0.0 }
   0x8   :  { %v87_v12 = vsub.f32 %v74_v1, %v86_v11  ;;  %v88_v13 = vsub.f32 %v75_v2, %v86_v11  ;;  %v89_v14 = vsub.f32 %v76_v3, %v86_v11  ;;  %v90_v15 = vsub.f32 %v77_v4, %v86_v11  ;;  %v184_v9 = vld [vmem:[#allocation2] sm:$0xff] }
   0x9   :  { %v118_v40 = vadd.f32 %v117_v38, %v116_v37  ;;  %v153_v54 = vsel %vm72_vm0, %v149_v50, 0.0  ;;  %v154_v55 = vsel %vm72_vm0, %v150_v51, 0.0  ;;  %v156_v61 = vsel %vm72_vm0, %v151_v57, 0.0 }
   0xa   :  { %v91_v16 = vmul.f32 1.442695, %v87_v12  ;;  %v93_v17 = vmul.f32 1.442695, %v88_v13  ;;  %v95_v18 = vmul.f32 1.442695, %v89_v14  ;;  %v155_v60 = vadd.f32 %v154_v55, %v153_v54 }
   0xb   :  { %v97_v19 = vmul.f32 1.442695, %v90_v15  ;;  %v120_v43 = vadd.f32 %v119_v41, %v118_v40  ;;  %v152_v62 = vsel %vm109_vm4, %v230_v58, 0.0 }
   0xc   :  { %232 = vpow2.f32 %v91_v16  ;;  %v157_v63 = vadd.f32 %v156_v61, %v155_v60  ;;  %v158_v0 = vsel %vm72_vm0, %v152_v62, 0.0 }
   0xd   :  { %234 = vpow2.f32 %v93_v17 }
   0xe   :  { %236 = vpow2.f32 %v95_v18  ;;  %v159_v1 = vadd.f32 %v158_v0, %v157_v63 }
   0xf   :  { %238 = vpow2.f32 %v97_v19 }
  0x10   :  { %v175_v5 = vsub.f32 0.0, %v159_v1 }
  0x16   :  { %v233_v20 = vpop.eup %232 }
  0x17   :  { %v235_v22 = vpop.eup %234  ;;  %v99_v23 = vsel %vm72_vm0, %v233_v20, 0.0 }
  0x18   :  { %v237_v24 = vpop.eup %236  ;;  %v100_v25 = vsel %vm72_vm0, %v235_v22, 0.0 }
  0x19   :  { %v239_v26 = vpop.eup %238  ;;  %v101_v27 = vadd.f32 %v100_v25, %v99_v23  ;;  %v102_v28 = vsel %vm72_vm0, %v237_v24, 0.0 }
  0x1a   :  { %v104_v29 = vsel %vm72_vm0, %v239_v26, 0.0 }
  0x1b   :  { %v103_v30 = vadd.f32 %v102_v28, %v101_v27 }
  0x1d   :  { %v105_v33 = vadd.f32 %v104_v29, %v103_v30 }
  0x1f   :  { %240 = vlog2.f32 %v105_v33 }
  0x29   :  { %v241_v42 = vpop.eup %240 }
  0x2a   :  { %v161_v44 = vmul.f32 0.6931472, %v241_v42 }
  0x2c   :  { %v162_v45 = vadd.f32 %v161_v44, %v86_v11 }
  0x2e   :  { %v163_v46 = vsub.f32 %v120_v43, %v162_v45 }
  0x30   :  { %v164_v47 = vmul.f32 1.442695, %v163_v46 }
  0x32   :  { %242 = vpow2.f32 %v164_v47 }
  0x3c   :  { %v243_v53 = vpop.eup %242 }
  0x3d   :  { %v166_v56 = vsub.f32 1.0, %v243_v53 }
  0x3f   :  { %v167_v59 = vmax.f32 %v166_v56, 0.0 }
  0x41   :  { %244 = vrsqrt.f32 %v167_v59  ;;  %vm170_vm5 = vcmp.eq.f32.partialorder %v167_v59, inf  ;;  %v173_v3 = vand.u32 2147483648, %v167_v59  ;;  %vm172_vm6 = vcmp.eq.f32.partialorder %v167_v59, 0.0 }
  0x4b   :  { %v245_v2 = vpop.eup %244 }
  0x4c   :  { %v169_v4 = vmul.f32 %v245_v2, %v167_v59 }
  0x4e   :  { %v171_v6 = vsel %vm170_vm5, %v167_v59, %v169_v4 }
  0x4f   :  { %v174_v7 = vsel %vm172_vm6, %v173_v3, %v171_v6 }
  0x50   :  { %v176_v8 = vmul.f32 %v175_v5, %v174_v7 }
  0x52   :  { %v177_v10 = vmul.f32 %v176_v8, %v163_v46 }
  0x54   :  { %v185_v11 = vadd.f32 %v184_v9, %v177_v10 }
  0x56   :  { %186 = vst.msk [vmem:[#allocation2] sm:$0xff] %vm72_vm0, %v185_v11 }
  0x5d   :  { %v208_v12 = vld [vmem:[#allocation2] sm:$0xff] }
  0x5e   :  { %210 = vst.msk [vmem:[%s327_s3] sm:$0xff] %vm72_vm0, %v208_v12 }

</bundles_post_ra>
